<compile_context>
chip_gen: v7x
topology: tpu7x:2x2x1
jax: 0.10.0
libtpu: 0.0.40
codegen_flags: <defaults>
</compile_context>

<pallas_src>
import jax
import jax.numpy as jnp
from jax.experimental import pallas as pl
from jax.experimental.pallas import tpu as pltpu

EPS = 1e-5


def mlp_kernel(x_ref, w1_ref, w2_ref, params_ref, o_ref):
    H = w1_ref.shape[1]
    P = w2_ref.shape[1]

    # ---- Linear 1 on the MXU: bf16 operands, f32 accumulation ----
    # Linear-1 bias intentionally omitted (cancels under training-mode BatchNorm).
    x_bf = x_ref[...].astype(jnp.bfloat16)
    w1_bf = w1_ref[...].astype(jnp.bfloat16)
    h = jnp.dot(x_bf, w1_bf, preferred_element_type=jnp.float32)        # (B, H) f32

    # ---- BatchNorm1d, training mode (batch mean, biased variance), one-pass stats ----
    b = h.shape[0]
    inv_b = 1.0 / b
    s = jnp.sum(h, axis=0, keepdims=True)                               # (1, H)
    sq = jnp.sum(h * h, axis=0, keepdims=True)                          # (1, H)
    mean = s * inv_b
    var = jnp.maximum(sq * inv_b - mean * mean, 0.0)                    # clamp >= 0
    inv_std = jax.lax.rsqrt(var + EPS)

    params = params_ref[...]                                            # (8, W) packed
    gamma = params[0:1, :H]
    beta = params[1:2, :H]
    b2 = params[2:3, :P]

    # Fused BN affine + ReLU: one mul + one add + one max on the (B, H) tensor.
    scale = gamma * inv_std                                             # (1, H)
    shift = beta - mean * scale                                         # (1, H)
    a = jnp.maximum(h * scale + shift, 0.0)                             # (B, H) f32

    # ---- Linear 2 on the MXU: bf16 operands, f32 accumulation ----
    a_bf = a.astype(jnp.bfloat16)
    w2_bf = w2_ref[...].astype(jnp.bfloat16)
    out = jnp.dot(a_bf, w2_bf, preferred_element_type=jnp.float32)      # (B, P)
    o_ref[...] = (out + b2).astype(o_ref.dtype)


def mlp_forward(x, w1, b1, gamma, beta, w2, b2):
    """Forward of MLP: Linear -> BatchNorm1d (training stats) -> ReLU -> Linear.

    `b1` is accepted for API parity with the PyTorch module but is unused: a Linear
    bias directly followed by training-mode BatchNorm cancels exactly.
    Weights are stored transposed vs. torch, i.e. (in, out), so the kernel does x @ W.
    """
    del b1  # mathematically a no-op before training-mode BN
    B, D = x.shape
    H = w1.shape[1]
    P = w2.shape[1]
    W = max(H, P)

    # Pack the tiny per-feature params into one sublane-aligned (8, W) slab
    # -> a single small DMA instead of three separate descriptors.
    params = jnp.zeros((8, W), jnp.float32)
    params = params.at[0, :H].set(gamma.reshape(-1).astype(jnp.float32))
    params = params.at[1, :H].set(beta.reshape(-1).astype(jnp.float32))
    params = params.at[2, :P].set(b2.reshape(-1).astype(jnp.float32))

    full = lambda shape: pl.BlockSpec(shape, lambda: tuple(0 for _ in shape))

    return pl.pallas_call(
        mlp_kernel,
        out_shape=jax.ShapeDtypeStruct((B, P), jnp.float32),
        grid_spec=pltpu.PrefetchScalarGridSpec(
            num_scalar_prefetch=0,
            grid=(),
            in_specs=[
                full((B, D)),   # x
                full((D, H)),   # w1
                full((H, P)),   # w2
                full((8, W)),   # packed gamma / beta / b2
            ],
            out_specs=full((B, P)),
        ),
    )(x, w1, w2, params)


def reference_forward(x, w1, b1, gamma, beta, w2, b2):
    """Reference with the same matmul precision strategy (bf16 operands, f32 acc).

    Includes b1 explicitly to verify the bias-cancellation identity used by the kernel.
    """
    h = jnp.dot(x.astype(jnp.bfloat16), w1.astype(jnp.bfloat16),
                preferred_element_type=jnp.float32) + b1
    mean = h.mean(axis=0, keepdims=True)
    var = ((h - mean) ** 2).mean(axis=0, keepdims=True)   # biased, like torch training BN
    h = (h - mean) * jax.lax.rsqrt(var + EPS)
    h = h * gamma + beta
    a = jnp.maximum(h, 0.0)
    return jnp.dot(a.astype(jnp.bfloat16), w2.astype(jnp.bfloat16),
                   preferred_element_type=jnp.float32) + b2


if __name__ == "__main__":
    # Small shapes consistent with the module: MLP(dim=32, projection_size=32, hidden_size=128)
    B, DIM, HIDDEN, PROJ = 8, 32, 128, 32

    key = jax.random.PRNGKey(0)
    kx, kw1, kb1, kw2, kb2 = jax.random.split(key, 5)

    x = jax.random.normal(kx, (B, DIM), dtype=jnp.float32)

    # PyTorch-style uniform init, weights stored as (in, out).
    bound1 = 1.0 / (DIM ** 0.5)
    w1 = jax.random.uniform(kw1, (DIM, HIDDEN), minval=-bound1, maxval=bound1, dtype=jnp.float32)
    b1 = jax.random.uniform(kb1, (1, HIDDEN), minval=-bound1, maxval=bound1, dtype=jnp.float32)

    gamma = jnp.ones((1, HIDDEN), dtype=jnp.float32)   # BatchNorm1d weight init
    beta = jnp.zeros((1, HIDDEN), dtype=jnp.float32)   # BatchNorm1d bias init

    bound2 = 1.0 / (HIDDEN ** 0.5)
    w2 = jax.random.uniform(kw2, (HIDDEN, PROJ), minval=-bound2, maxval=bound2, dtype=jnp.float32)
    b2 = jax.random.uniform(kb2, (1, PROJ), minval=-bound2, maxval=bound2, dtype=jnp.float32)

    out = mlp_forward(x, w1, b1, gamma, beta, w2, b2)
    out = jax.block_until_ready(out)

    ref = reference_forward(x, w1, b1, gamma, beta, w2, b2)
    assert out.shape == (B, PROJ)
    # bf16 matmul operands + different (but equivalent) BN algebra -> small numeric drift.
    assert jnp.allclose(out, ref, atol=2e-2, rtol=2e-2), "mismatch vs JAX reference"

    print("KERNEL_OK")
</pallas_src>

<mosaic_0001>
module attributes {stable_mosaic.version = 11 : i64} {
  func.func @mlp_kernel(%arg0: memref<8x32xf32, #tpu.memory_space<vmem>>, %arg1: memref<32x128xf32, #tpu.memory_space<vmem>>, %arg2: memref<128x32xf32, #tpu.memory_space<vmem>>, %arg3: memref<8x128xf32, #tpu.memory_space<vmem>>, %arg4: memref<8x32xf32, #tpu.memory_space<vmem>>) attributes {dimension_semantics = [], scalar_prefetch = 0 : i64, scratch_operands = 0 : i64, tpu.core_type = #tpu.core_type<tc>} {
    %c0 = arith.constant 0 : index
    %c0_0 = arith.constant 0 : index
    %0 = vector.load %arg0[%c0, %c0_0] : memref<8x32xf32, #tpu.memory_space<vmem>>, vector<8x32xf32>
    %1 = arith.truncf %0 : vector<8x32xf32> to vector<8x32xbf16>
    %c0_1 = arith.constant 0 : index
    %c0_2 = arith.constant 0 : index
    %2 = vector.load %arg1[%c0_1, %c0_2] : memref<32x128xf32, #tpu.memory_space<vmem>>, vector<32x128xf32>
    %3 = arith.truncf %2 : vector<32x128xf32> to vector<32x128xbf16>
    %cst = arith.constant dense<0.000000e+00> : vector<8x128xf32>
    %4 = tpu.matmul %1, %3, %cst {dimension_numbers = #tpu.dot_dimension_numbers<[1], [0], [0], [1], [0, 0, 1, 1], [], []>} : vector<8x32xbf16>, vector<32x128xbf16>, vector<8x128xf32> -> vector<8x128xf32>
    %cst_3 = arith.constant dense<0.000000e+00> : vector<128xf32>
    %5 = vector.multi_reduction <add>, %4, %cst_3 [0] : vector<8x128xf32> to vector<128xf32>
    %6 = vector.shape_cast %5 : vector<128xf32> to vector<1x128xf32>
    %7 = arith.mulf %4, %4 : vector<8x128xf32>
    %cst_4 = arith.constant dense<0.000000e+00> : vector<128xf32>
    %8 = vector.multi_reduction <add>, %7, %cst_4 [0] : vector<8x128xf32> to vector<128xf32>
    %9 = vector.shape_cast %8 : vector<128xf32> to vector<1x128xf32>
    %cst_5 = arith.constant 1.250000e-01 : f32
    %10 = vector.broadcast %cst_5 : f32 to vector<1x128xf32>
    %11 = arith.mulf %6, %10 : vector<1x128xf32>
    %cst_6 = arith.constant 1.250000e-01 : f32
    %12 = vector.broadcast %cst_6 : f32 to vector<1x128xf32>
    %13 = arith.mulf %9, %12 : vector<1x128xf32>
    %14 = arith.mulf %11, %11 : vector<1x128xf32>
    %15 = arith.subf %13, %14 : vector<1x128xf32>
    %cst_7 = arith.constant 0.000000e+00 : f32
    %16 = vector.broadcast %cst_7 : f32 to vector<1x128xf32>
    %17 = arith.maximumf %15, %16 : vector<1x128xf32>
    %cst_8 = arith.constant 9.99999974E-6 : f32
    %18 = vector.broadcast %cst_8 : f32 to vector<1x128xf32>
    %19 = arith.addf %17, %18 : vector<1x128xf32>
    %20 = math.rsqrt %19 : vector<1x128xf32>
    %c0_9 = arith.constant 0 : index
    %c0_10 = arith.constant 0 : index
    %21 = vector.load %arg3[%c0_9, %c0_10] : memref<8x128xf32, #tpu.memory_space<vmem>>, vector<8x128xf32>
    %22 = vector.extract_strided_slice %21 {offsets = [0, 0], sizes = [1, 128], strides = [1, 1]} : vector<8x128xf32> to vector<1x128xf32>
    %23 = vector.extract_strided_slice %21 {offsets = [1, 0], sizes = [1, 128], strides = [1, 1]} : vector<8x128xf32> to vector<1x128xf32>
    %24 = vector.extract_strided_slice %21 {offsets = [2, 0], sizes = [1, 32], strides = [1, 1]} : vector<8x128xf32> to vector<1x32xf32>
    %25 = arith.mulf %22, %20 : vector<1x128xf32>
    %26 = arith.mulf %11, %25 : vector<1x128xf32>
    %27 = arith.subf %23, %26 : vector<1x128xf32>
    %28 = vector.broadcast %25 : vector<1x128xf32> to vector<8x128xf32>
    %29 = arith.mulf %4, %28 : vector<8x128xf32>
    %30 = vector.broadcast %27 : vector<1x128xf32> to vector<8x128xf32>
    %31 = arith.addf %29, %30 : vector<8x128xf32>
    %cst_11 = arith.constant 0.000000e+00 : f32
    %32 = vector.broadcast %cst_11 : f32 to vector<8x128xf32>
    %33 = arith.maximumf %31, %32 : vector<8x128xf32>
    %34 = arith.truncf %33 : vector<8x128xf32> to vector<8x128xbf16>
    %c0_12 = arith.constant 0 : index
    %c0_13 = arith.constant 0 : index
    %35 = vector.load %arg2[%c0_12, %c0_13] : memref<128x32xf32, #tpu.memory_space<vmem>>, vector<128x32xf32>
    %36 = arith.truncf %35 : vector<128x32xf32> to vector<128x32xbf16>
    %cst_14 = arith.constant dense<0.000000e+00> : vector<8x32xf32>
    %37 = tpu.matmul %34, %36, %cst_14 {dimension_numbers = #tpu.dot_dimension_numbers<[1], [0], [0], [1], [0, 0, 1, 1], [], []>} : vector<8x128xbf16>, vector<128x32xbf16>, vector<8x32xf32> -> vector<8x32xf32>
    %38 = vector.broadcast %24 : vector<1x32xf32> to vector<8x32xf32>
    %39 = arith.addf %37, %38 : vector<8x32xf32>
    %c0_15 = arith.constant 0 : index
    %c0_16 = arith.constant 0 : index
    %40 = vector.load %arg4[%c0_15, %c0_16] : memref<8x32xf32, #tpu.memory_space<vmem>>, vector<8x32xf32>
    tpu.vector_store %arg4[%c0_15, %c0_16], %39 {strides = array<i32>} : memref<8x32xf32, #tpu.memory_space<vmem>>, vector<8x32xf32>,
    return
  }
}

</mosaic_0001>

<bundles_post_ra>
// kernel: tpu_custom_call.1
= control target key start
LH: loop header
LB: loop body
LE: loop exit
PB: predicated region body
PF: predicated region fallthrough
CT: control target
= control target key end

     0   :  { %v263_v3 = vmov 0.0   ;;  %vm264_vm0 = vmmov 0   ;;  %s371_s0 = inlined_call_operand.vmem [shape: f32[8,32], index: 0, kind: input, shape index: {}]   ;;  %s372_s1 = inlined_call_operand.vmem [shape: f32[32,128], index: 1, kind: input, shape index: {}]   ;;  %s373_s2 = inlined_call_operand.vmem [shape: f32[128,32], index: 2, kind: input, shape index: {}]   ;;  %s374_s3 = inlined_call_operand.vmem [shape: f32[8,128], index: 3, kind: input, shape index: {}]   ;;  %s375_s4 = inlined_call_operand.hbm [shape: f32[8,32], index: 4, kind: output, shape index: {}]  }
   0x1   :  { %v21_v0 = vld [vmem:[%s372_s1] sm:$0xff]  ;;  %v22_v1 = vld [vmem:[%s372_s1 + $0x8] sm:$0xff]  ;;  %v23_v2 = vld [vmem:[%s372_s1 + $0x10] sm:$0xff]  ;;  %206 = vmatprep.subr.bf16.mxu0 %v263_v3  ;;  %210 = vmatprep.mubr.msk.bf16.mxu0 %vm264_vm0, %v263_v3 }
   0x2   :  { %v25_v4 = vpack.c.bf16 %v22_v1, %v21_v0  ;;  %v24_v5 = vld [vmem:[%s372_s1 + $0x18] sm:$0xff] }
   0x3   :  { %9 = vsyncpa [#allocation3], 0  ;;  %214 = vmatprep.subr.bf16.mxu1 %v263_v3  ;;  %230 = vmatprep.mubr.msk.bf16.mxu1 %vm264_vm0, %v263_v3  ;;  %v26_v6 = vpack.c.bf16 %v24_v5, %v23_v2  ;;  %v19_v7 = vld [vmem:[%s371_s0] sm:$0xff]  ;;  %vm27_vm1 = vcmask 261120   ;;  %v111_v10 = vld [vmem:[%s373_s2 + $0x8] sm:$0xff]  ;;  %v98_v56 = vlaneseq  ;;  %s265_s29 = smov [#allocation2]  }
   0x4   :  { %207 = vmatpush3.bf16.msra.mxu0 %v25_v4  ;;  %v20_v8 = vpack.c.bf16 %v19_v7, %v19_v7  ;;  %v110_v9 = vld [vmem:[%s373_s2] sm:$0xff]  ;;  %v112_v12 = vld [vmem:[%s373_s2 + $0x10] sm:$0xff]  ;;  %v113_v13 = vld [vmem:[%s373_s2 + $0x18] sm:$0xff]  ;;  %s185_s0 = sshll.u32 %s265_s29, 4  ;;  %s186_s0 = int_to_ptr.vmem [resolvable:$true] %s185_s0 }
   0x5   :  { %208 = vmatprep.subr.bf16.mxu0 %v263_v3  ;;  %v126_v11 = vpack.c.bf16 %v111_v10, %v110_v9  ;;  %v127_v14 = vpack.c.bf16 %v113_v13, %v112_v12  ;;  %v114_v15 = vld [vmem:[%s373_s2 + $0x20] sm:$0xff]  ;;  %v115_v16 = vld [vmem:[%s373_s2 + $0x28] sm:$0xff]  ;;  %v116_v18 = vld [vmem:[%s373_s2 + $0x30] sm:$0xff]  ;;  %v99_v57 = vshrl.u32 %v98_v56, 7  ;;  %p244_p1 = scmp.lt.s32.totalorder %s186_s0, %s186_s0 }
   0x6   :  { %v128_v17 = vpack.c.bf16 %v115_v16, %v114_v15  ;;  %v117_v19 = vld [vmem:[%s373_s2 + $0x38] sm:$0xff]  ;;  %v118_v21 = vld [vmem:[%s373_s2 + $0x40] sm:$0xff]  ;;  %v119_v22 = vld [vmem:[%s373_s2 + $0x48] sm:$0xff] }
   0x7   :  { %215 = vmatpush3.bf16.msra.mxu1 %v126_v11  ;;  %v129_v20 = vpack.c.bf16 %v117_v19, %v116_v18  ;;  %v130_v23 = vpack.c.bf16 %v119_v22, %v118_v21  ;;  %v120_v24 = vld [vmem:[%s373_s2 + $0x50] sm:$0xff]  ;;  %v121_v25 = vld [vmem:[%s373_s2 + $0x58] sm:$0xff]  ;;  %v122_v27 = vld [vmem:[%s373_s2 + $0x60] sm:$0xff]  ;;  %v100_v61 = vsub.s32 0, %v99_v57  ;;  %v105_v1 = vsub.s32 1, %v99_v57 }
   0x8   :  { %209 = vmatpush3.bf16.msra.mxu0 %v26_v6  ;;  %216 = vmatprep.subr.bf16.mxu1 %v263_v3  ;;  %v131_v26 = vpack.c.bf16 %v121_v25, %v120_v24  ;;  %v123_v28 = vld [vmem:[%s373_s2 + $0x68] sm:$0xff]  ;;  %v124_v30 = vld [vmem:[%s373_s2 + $0x70] sm:$0xff]  ;;  %v125_v31 = vld [vmem:[%s373_s2 + $0x78] sm:$0xff] }
   0x9   :  { %v132_v29 = vpack.c.bf16 %v123_v28, %v122_v27  ;;  %v133_v32 = vpack.c.bf16 %v125_v31, %v124_v30  ;;  %v91_v58 = vld [vmem:[%s374_s3] sm:$0xff]  ;;  %s239_s3 = scalar_lea.vmem %s186_s0, 128 }
   0xa   :  { %p240_p0 = scmp.ne.s32.totalorder %s186_s0, %s239_s3  ;;  %p245_p2 = scmp.lt.s32.totalorder %s239_s3, %s239_s3 }
   0xb   :  { %211 = vmatmul.mubr.msk.bf16.vlgmr.msra.gmra.mrb[0].mxu0 %vm27_vm1, %v20_v8  ;;  %217 = vmatpush3.bf16.msra.mxu1 %v127_v14  ;;  %v136_v8 = vsub.s32 2, %v99_v57 }
   0xc   :  { %218 = vmatprep.subr.bf16.mxu1 %v263_v3  ;;  %p246_p3 = por %p245_p2, %p244_p1 }
   0xd   :  { %v137_v9 = vrot.slane %v91_v58, %v136_v8 }
   0xe   :  { %p247_p4 = pnand %p246_p3, %p240_p0 }
   0xf   :  { %219 = vmatpush3.bf16.msra.mxu1 %v128_v17 }
  0x10   :  { %220 = vmatprep.subr.bf16.mxu1 %v263_v3 }
  0x13   :  { %221 = vmatpush3.bf16.msra.mxu1 %v129_v20 }
  0x14   :  { %222 = vmatprep.subr.bf16.mxu1 %v263_v3 }
  0x17   :  { %223 = vmatpush3.bf16.msra.mxu1 %v130_v23 }
  0x18   :  { %224 = vmatprep.subr.bf16.mxu1 %v263_v3 }
  0x1b   :  { %225 = vmatpush3.bf16.msra.mxu1 %v131_v26 }
  0x1c   :  { %226 = vmatprep.subr.bf16.mxu1 %v263_v3 }
  0x1f   :  { %227 = vmatpush3.bf16.msra.mxu1 %v132_v29 }
  0x20   :  { %228 = vmatprep.subr.bf16.mxu1 %v263_v3 }
  0x23   :  { %229 = vmatpush3.bf16.msra.mxu1 %v133_v32 }
  0xde   :  { %v65_v33 = vpop.f32.mrb[0].mxu0 }
  0xdf   :  { %v71_v34 = vrot.slane %v65_v33, 4  ;;  %v77_v35 = vmul.f32 %v65_v33, %v65_v33  ;;  %v212_v36 = vpop.f32.mrb[1].mxu0 }
  0xe0   :  { %v68_v37 = vpop.f32.mrb[2].mxu0 }
  0xe1   :  { %v72_v38 = vadd.f32 %v71_v34, %v65_v33  ;;  %v78_v39 = vrot.slane %v77_v35, 4  ;;  %v213_v40 = vpop.f32.mrb[3].mxu0 }
  0xe3   :  { %v73_v41 = vrot.slane %v72_v38, 2  ;;  %v79_v42 = vadd.f32 %v78_v39, %v77_v35 }
  0xe5   :  { %v74_v43 = vadd.f32 %v73_v41, %v72_v38  ;;  %v80_v44 = vrot.slane %v79_v42, 2 }
  0xe7   :  { %v75_v45 = vrot.slane %v74_v43, 1  ;;  %v81_v46 = vadd.f32 %v80_v44, %v79_v42 }
  0xe9   :  { %v76_v47 = vadd.f32 %v75_v45, %v74_v43  ;;  %v82_v48 = vrot.slane %v81_v46, 1 }
  0xeb   :  { %v83_v49 = vadd.f32 %v82_v48, %v81_v46  ;;  %v84_v50 = vmul.f32 0.125, %v76_v47 }
  0xed   :  { %v85_v51 = vmul.f32 0.125, %v83_v49  ;;  %v86_v52 = vmul.f32 %v84_v50, %v84_v50 }
  0xef   :  { %v87_v53 = vsub.f32 %v85_v51, %v86_v52 }
  0xf1   :  { %v88_v54 = vmax.f32 %v87_v53, 0.0 }
  0xf3   :  { %v89_v55 = vadd.f32 1e-05, %v88_v54 }
  0xf5   :  { %237 = vrsqrt.f32 %v89_v55 }
  0xff   :  { %v238_v59 = vpop.eup %237 }
 0x100   :  { %v92_v60 = vmul.f32 %v238_v59, %v91_v58 }
 0x102   :  { %v93_v62 = vmul.f32 %v92_v60, %v84_v50  ;;  %v101_v63 = vrot.slane %v92_v60, %v100_v61 }
 0x104   :  { %v95_v0 = vrot.slane %v93_v62, 7  ;;  %v102_v3 = vmul.f32 %v101_v63, %v65_v33 }
 0x106   :  { %v97_v2 = vsub.f32 %v91_v58, %v95_v0 }
 0x108   :  { %v106_v4 = vrot.slane %v97_v2, %v105_v1 }
 0x10a   :  { %v107_v5 = vadd.f32 %v106_v4, %v102_v3 }
 0x10c   :  { %v108_v6 = vmax.f32 %v107_v5, 0.0 }
 0x10e   :  { %v109_v7 = vpack.c.bf16 %v108_v6, %v108_v6 }
 0x110   :  { %231 = vmatmul.mubr.bf16.vlgmr.msra.gmra.mrb[0].mxu1 %v109_v7 }
 0x1e3   :  { %v172_v10 = vpop.f32.mrb[0].mxu1 }
 0x1e4   :  { %v173_v11 = vadd.f32 %v172_v10, %v137_v9  ;;  %v232_v12 = vpop.f32.mrb[1].mxu1 }
 0x1e5   :  { %v175_v13 = vpop.f32.mrb[2].mxu1 }
 0x1e6   :  { %178 = vst.msk [vmem:[#allocation2] sm:$0xff] %vm27_vm1, %v173_v11  ;;  %v233_v14 = vpop.f32.mrb[3].mxu1 }
 0x1e7   :  { %250 = shalt.err (!%p247_p4)
}
 0x1e8   :  { %s251_s6 = scalar_lea.hbm %s375_s4, 128 }
 0x1e9   :  { %p252_p5 = scmp.ne.s32.totalorder %s375_s4, %s251_s6  ;;  %p255_p6 = scmp.lt.u32.totalorder %s251_s6, %s375_s4 }
 0x1eb   :  { %p257_p7 = pnand %p255_p6, %p252_p5 }
 0x1ed   :  { %260 = shalt.err (!%p257_p7)
}
 0x1ee   :  { %188 = dma.vmem_to_hbm [thread:$0]  %s186_s0, 128, %s375_s4, [#allocation3]  }
 0x1ef   :  { %261 = dma.done.wait [#allocation3], 128  }
 0x1f0   :  { %262 = vsyncadd [#allocation3], 4294967168 }
 0x1f1   :  { %192 = vsyncpa [#allocation3], 1 }

</bundles_post_ra>
